<compile_context>
chip_gen: v5e
topology: v5e:2x2
jax: 0.10.0
libtpu: 0.0.40
codegen_flags: <defaults>
</compile_context>

<pallas_src>
import numpy as np
import jax
import jax.numpy as jnp
from jax.experimental import pallas as pl
from jax.experimental.pallas import tpu as pltpu


def _round_up(a, b):
    return (a + b - 1) // b * b


# ----------------------------- Pallas kernels ------------------------------ #

def _segment_sum_kernel(ets_ref, gp_ref, p_ref, o_ref):
    # p_node[n] += sum_{e in tile, group_ptr[e]==n} p[e]
    # gp_ref: [TK,1] int32 (pad=-1), p_ref: [TK,1] f32, o_ref: [1,TNL] f32
    del ets_ref  # only consumed by the index_maps
    @pl.when(pl.program_id(1) == 0)
    def _():
        o_ref[...] = jnp.zeros_like(o_ref)

    tk = gp_ref.shape[0]
    tnl = o_ref.shape[1]
    lane_ids = (jax.lax.broadcasted_iota(jnp.int32, (tk, tnl), 1)
                + pl.program_id(0) * tnl)
    contrib = jnp.where(lane_ids == gp_ref[...], p_ref[...], 0.0)       # [TK, TNL]
    o_ref[...] += jnp.sum(contrib, axis=0, keepdims=True)               # [1, TNL]


def _mean_pool_kernel(nts_ref, b_ref, w_ref, x_ref, o_ref):
    # out[g] += sum_{j: batch[j]==g} w[j] * x[j]  (w already holds p/count)
    # b_ref/w_ref: [1,TN] (lane-dense, pad batch=-1), x_ref: [TN,TCC], o_ref: [TG,TCC]
    del nts_ref
    @pl.when(pl.program_id(2) == 0)
    def _():
        o_ref[...] = jnp.zeros_like(o_ref)

    tg = o_ref.shape[0]
    tn = x_ref.shape[0]
    row_ids = (jax.lax.broadcasted_iota(jnp.int32, (tg, tn), 0)
               + pl.program_id(0) * tg)
    # fold the per-node weight straight into the indicator -> single MXU matmul
    ind = jnp.where(row_ids == b_ref[...], w_ref[...], 0.0)             # [TG, TN]
    o_ref[...] += jnp.dot(ind, x_ref[...], preferred_element_type=jnp.float32)


def _max_pool_kernel(nts_ref, b_ref, w_ref, x_ref, o_ref):
    # out[g] = max_{j: batch[j]==g} w[j] * x[j]   (VPU select + XLU sublane reduce)
    # b_ref: [TN,1] int32 (pad=-1), w_ref: [TN,1] f32, x_ref: [TN,TCC], o_ref: [TG,TCC]
    del nts_ref
    @pl.when(pl.program_id(2) == 0)
    def _():
        o_ref[...] = jnp.full_like(o_ref, -jnp.inf)

    tg = o_ref.shape[0]
    base = pl.program_id(0) * tg                                        # hoisted
    xw = x_ref[...] * w_ref[...]                                        # [TN, TCC]
    bcol = b_ref[...]                                                   # [TN, 1]
    rows = []
    for j in range(tg):                                                 # small static unroll
        cand = jnp.where(bcol == base + j, xw, -jnp.inf)                # [TN, TCC]
        rows.append(jnp.max(cand, axis=0, keepdims=True))               # [1, TCC]
    cand_tile = jnp.concatenate(rows, axis=0)                           # [TG, TCC]
    o_ref[...] = jnp.maximum(o_ref[...], cand_tile)                     # one dense store


# --------------------------- pallas_call wrappers --------------------------- #

def segment_sum_pallas(p, group_ptr_np, n_out, *, tk=1024, tnl=128):
    """scatter(p, group_ptr, reduce='sum') for a 1-D p -> [n_out]."""
    ne = int(p.shape[0])
    gp = np.asarray(group_ptr_np, np.int64)
    p = p.astype(jnp.float32)

    # host-side sort so every output lane-tile owns a contiguous edge range
    if not bool(np.all(np.diff(gp) >= 0)):
        perm = np.argsort(gp, kind="stable")
        gp = gp[perm]
        p = jnp.take(p, jnp.asarray(perm, dtype=jnp.int32))

    tk = min(tk, _round_up(ne, 8))
    ne_pad = _round_up(ne, tk)
    nl_pad = _round_up(n_out, tnl)
    n_lane_tiles = nl_pad // tnl
    n_edge_tiles = ne_pad // tk

    # per-lane-tile edge-tile window -> SMEM scalar prefetch (kills the all-pairs grid)
    bounds = np.searchsorted(gp, np.arange(n_lane_tiles + 1, dtype=np.int64) * tnl)
    t_lo = bounds[:-1] // tk
    t_hi = (bounds[1:] + tk - 1) // tk
    max_et = int(max(int(np.max(np.maximum(t_hi - t_lo, 0))), 1))
    et_start = np.clip(t_lo, 0, n_edge_tiles - max_et).astype(np.int32)

    p_col = jnp.pad(p.reshape(-1, 1), ((0, ne_pad - ne), (0, 0)))
    gp_col = np.full((ne_pad, 1), -1, np.int32)
    gp_col[:ne, 0] = gp

    out = pl.pallas_call(
        _segment_sum_kernel,
        out_shape=jax.ShapeDtypeStruct((1, nl_pad), jnp.float32),
        grid_spec=pltpu.PrefetchScalarGridSpec(
            num_scalar_prefetch=1,
            grid=(n_lane_tiles, max_et),
            in_specs=[pl.BlockSpec((tk, 1), lambda i, k, ets: (ets[i] + k, 0)),
                      pl.BlockSpec((tk, 1), lambda i, k, ets: (ets[i] + k, 0))],
            out_specs=pl.BlockSpec((1, tnl), lambda i, k, ets: (0, i))),
        compiler_params=pltpu.CompilerParams(
            dimension_semantics=("parallel", "arbitrary")),
    )(jnp.asarray(et_start), jnp.asarray(gp_col), p_col)
    return out[0, :n_out]


def pool_pallas(x, w, batch_np, ng, mode, *, tn=512, tg=None, tcc=None):
    """Weighted global mean/max pool: x [N,C], w [N], batch [N] -> [ng, C]."""
    N, C = x.shape
    batch = np.asarray(batch_np, np.int64)

    # lane-dense channel tiles: pad C to a multiple of 128 (256-aligned when possible)
    c_pad = _round_up(C, 128)
    if tcc is None:
        tcc = 256 if c_pad % 256 == 0 else 128
    tcc = min(tcc, c_pad)

    # graph tile: large for mean (fills MXU M dim), moderate for max (unroll length)
    if tg is None:
        tg = 128 if mode == "mean" else 16
    tg = min(tg, _round_up(ng, 8))
    ng_pad = _round_up(ng, tg)
    g_tiles = ng_pad // tg

    # node tile: big enough that each grid step moves ~0.5 MiB
    tn = min(tn, _round_up(N, 8))
    n_pad = _round_up(N, tn)
    n_tiles = n_pad // tn

    # per-graph-tile node-tile window (scalar prefetch).  `batch` is sorted in PyG, so each
    # graph tile owns a contiguous node range; fall back to the full range if unsorted.
    if bool(np.all(np.diff(batch) >= 0)):
        bounds = np.searchsorted(batch, np.arange(g_tiles + 1, dtype=np.int64) * tg)
        t_lo = bounds[:-1] // tn
        t_hi = (bounds[1:] + tn - 1) // tn
        max_nt = int(max(int(np.max(np.maximum(t_hi - t_lo, 0))), 1))
        nt_start = np.clip(t_lo, 0, n_tiles - max_nt).astype(np.int32)
    else:
        max_nt = n_tiles
        nt_start = np.zeros((g_tiles,), np.int32)

    x_p = jnp.pad(x.astype(jnp.float32), ((0, n_pad - N), (0, c_pad - C)))
    w_f = w.astype(jnp.float32)
    b_host = np.full((n_pad,), -1, np.int32)
    b_host[:N] = batch

    if mode == "mean":
        kernel = _mean_pool_kernel
        b_arr = jnp.asarray(b_host.reshape(1, n_pad))
        w_arr = jnp.pad(w_f.reshape(1, -1), ((0, 0), (0, n_pad - N)))
        bw_spec = pl.BlockSpec((1, tn), lambda g, c, n, nts: (0, nts[g] + n))
    else:  # max
        kernel = _max_pool_kernel
        b_arr = jnp.asarray(b_host.reshape(n_pad, 1))
        w_arr = jnp.pad(w_f.reshape(-1, 1), ((0, n_pad - N), (0, 0)))
        bw_spec = pl.BlockSpec((tn, 1), lambda g, c, n, nts: (nts[g] + n, 0))

    out = pl.pallas_call(
        kernel,
        out_shape=jax.ShapeDtypeStruct((ng_pad, c_pad), jnp.float32),
        grid_spec=pltpu.PrefetchScalarGridSpec(
            num_scalar_prefetch=1,
            grid=(g_tiles, c_pad // tcc, max_nt),
            in_specs=[bw_spec, bw_spec,
                      pl.BlockSpec((tn, tcc), lambda g, c, n, nts: (nts[g] + n, c))],
            out_specs=pl.BlockSpec((tg, tcc), lambda g, c, n, nts: (g, c))),
        compiler_params=pltpu.CompilerParams(
            dimension_semantics=("parallel", "parallel", "arbitrary")),
    )(jnp.asarray(nt_start), b_arr, w_arr, x_p)
    return out[:ng, :C]


# ------------------------------- module glue -------------------------------- #

def ego_graph_pooling(x_root, xs, p, batch_np, mode, num_groups, group_ptr=None):
    """Forward pass of EgoGraphPooling(mode, num_groups)."""
    mode = mode.lower()
    assert mode in ("mean", "max")
    xs = list(xs)
    N = int(xs[0].shape[0])
    batch = np.asarray(batch_np, np.int64)
    ng = int(batch.max()) + 1
    assert x_root.shape[0] == ng

    # 1) optional reduction of p from the expanded node set      (Pallas kernel)
    if group_ptr is not None and int(p.shape[0]) > N:
        p_node = segment_sum_pallas(p, group_ptr, N)
    else:
        p_node = p.astype(jnp.float32)

    # channel-concat of all hop tensors (index plumbing) -> one streaming pass, dense lanes
    # TODO(synk): fuse the per-hop concat into the pooling pallas_call (manual per-hop DMA)
    #             to drop one extra HBM read+write of the features.
    x_cat = jnp.concatenate(xs, axis=-1) if len(xs) > 1 else xs[0]

    # fold 1/count (mean normalizer) into the per-node scale so the kernel is one matmul
    if mode == "mean":
        counts = np.bincount(batch, minlength=ng).astype(np.float32)
        inv_cnt = 1.0 / np.maximum(counts, 1.0)   # empty graphs -> 0 (torch would give NaN)
        w = p_node * jnp.asarray(inv_cnt[batch])
    else:
        w = p_node

    # 2) weighted global pooling over `batch`                      (Pallas kernel)
    pooled = pool_pallas(x_cat, w, batch, ng, mode)                  # [ng, sum(C_i)]

    # 3) concat with root features + num_groups fold               (index plumbing)
    out = jnp.concatenate([x_root.astype(jnp.float32), pooled], axis=-1)
    if num_groups > 1:
        d = out.shape[-1]
        out = out.reshape(num_groups, -1, d)
        out = jnp.concatenate([out[i] for i in range(num_groups)], axis=-1)
    return out


def _reference(x_root, xs, p, batch_np, mode, num_groups, group_ptr=None):
    xs = list(xs)
    N = xs[0].shape[0]
    if group_ptr is not None and p.shape[0] > N:
        p = jax.ops.segment_sum(p, jnp.asarray(group_ptr, jnp.int32), num_segments=N)
    ng = int(np.asarray(batch_np).max()) + 1
    b = jnp.asarray(np.asarray(batch_np), jnp.int32)
    pooled = []
    for x in xs:
        xw = x * p.reshape(-1, 1)
        if mode == "mean":
            s = jax.ops.segment_sum(xw, b, num_segments=ng)
            c = jax.ops.segment_sum(jnp.ones((N,), jnp.float32), b, num_segments=ng)
            pooled.append(s / c[:, None])
        else:
            pooled.append(jax.ops.segment_max(xw, b, num_segments=ng))
    out = jnp.concatenate([x_root] + pooled, axis=-1)
    if num_groups > 1:
        d = out.shape[-1]
        out = out.reshape(num_groups, -1, d)
        out = jnp.concatenate([out[i] for i in range(num_groups)], axis=-1)
    return out


# ----------------------------------- main ------------------------------------ #

if __name__ == "__main__":
    key = jax.random.PRNGKey(0)
    ks = jax.random.split(key, 8)

    G = 2                                  # num_groups
    NG = 4                                 # ego-graphs in the batch (2 groups x 2)
    sizes = [10, 6, 9, 7]                  # uneven graphs, sorted `batch`
    N = int(np.sum(sizes))                 # 32 nodes
    H = 2                                  # hop tensors in xs
    C, C_root = 16, 16

    batch_np = np.repeat(np.arange(NG, dtype=np.int32), sizes)

    x_root = jax.random.normal(ks[0], (NG, C_root), jnp.float32)
    xs = [jax.random.normal(ks[1 + i], (N, C), jnp.float32) for i in range(H)]

    # p on the *expanded* node set to exercise the group_ptr scatter branch
    N_exp = 2 * N
    p = jax.random.uniform(ks[4], (N_exp,), jnp.float32) + 0.5
    group_ptr_np = np.concatenate(
        [np.arange(N, dtype=np.int32), np.arange(N, dtype=np.int32)])

    for mode in ("mean", "max"):
        out = ego_graph_pooling(x_root, xs, p, batch_np, mode, G, group_ptr=group_ptr_np)
        out = jax.block_until_ready(out)
        ref = jax.block_until_ready(
            _reference(x_root, xs, p, batch_np, mode, G, group_ptr_np))
        np.testing.assert_allclose(np.asarray(out), np.asarray(ref), rtol=1e-2, atol=1e-2)

    # unsorted `batch` (exercises the full-range fallback; p already on the node set)
    rng = np.random.default_rng(0)
    perm = rng.permutation(N)
    batch_sh = batch_np[perm]
    xs_sh = [x[jnp.asarray(perm)] for x in xs]
    p_sh = jax.random.uniform(ks[5], (N,), jnp.float32) + 0.5
    out = jax.block_until_ready(ego_graph_pooling(x_root, xs_sh, p_sh, batch_sh, "mean", G))
    ref = jax.block_until_ready(_reference(x_root, xs_sh, p_sh, batch_sh, "mean", G))
    np.testing.assert_allclose(np.asarray(out), np.asarray(ref), rtol=1e-2, atol=1e-2)

    print("KERNEL_OK")
</pallas_src>

<mosaic_0001>
module attributes {stable_mosaic.version = 11 : i64} {
  func.func @_segment_sum_kernel(%arg0: i32, %arg1: i32, %arg2: memref<1xi32, #tpu.memory_space<smem>>, %arg3: memref<64x1xi32, #tpu.memory_space<vmem>>, %arg4: memref<64x1xf32, #tpu.memory_space<vmem>>, %arg5: memref<1x128xf32, #tpu.memory_space<vmem>>) attributes {dimension_semantics = [#tpu.dimension_semantics<parallel>, #tpu.dimension_semantics<arbitrary>], iteration_bounds = array<i64: 1, 1>, scalar_prefetch = 1 : i64, scratch_operands = 0 : i64, tpu.core_type = #tpu.core_type<tc>, window_params = [{transform_indices = @transform_0, window_bounds = array<i64: 64, 1>}, {transform_indices = @transform_1, window_bounds = array<i64: 64, 1>}, {transform_indices = @transform_2, window_bounds = array<i64: 1, 128>}]} {
    %c0_i32 = arith.constant 0 : i32
    %0 = arith.cmpi eq, %arg1, %c0_i32 : i32
    %1 = arith.extui %0 : i1 to i32
    %c0_i32_0 = arith.constant 0 : i32
    %2 = arith.cmpi ne, %1, %c0_i32_0 : i32
    scf.if %2 {
      %cst_9 = arith.constant 0.000000e+00 : f32
      %20 = vector.broadcast %cst_9 : f32 to vector<1x128xf32>
      %c0_10 = arith.constant 0 : index
      %c0_11 = arith.constant 0 : index
      %21 = vector.load %arg5[%c0_10, %c0_11] : memref<1x128xf32, #tpu.memory_space<vmem>>, vector<1x128xf32>
      tpu.vector_store %arg5[%c0_10, %c0_11], %20 {strides = array<i32>} : memref<1x128xf32, #tpu.memory_space<vmem>>, vector<1x128xf32>,
    } else {
    }
    %3 = tpu.iota {dimensions = array<i32: 1>} : vector<64x128xi32>
    %c128_i32 = arith.constant 128 : i32
    %4 = arith.muli %arg0, %c128_i32 : i32
    %5 = vector.broadcast %4 : i32 to vector<64x128xi32>
    %6 = arith.addi %3, %5 : vector<64x128xi32>
    %c0 = arith.constant 0 : index
    %c0_1 = arith.constant 0 : index
    %7 = vector.load %arg3[%c0, %c0_1] : memref<64x1xi32, #tpu.memory_space<vmem>>, vector<64x1xi32>
    %8 = vector.broadcast %7 : vector<64x1xi32> to vector<64x128xi32>
    %9 = arith.cmpi eq, %6, %8 : vector<64x128xi32>
    %c0_2 = arith.constant 0 : index
    %c0_3 = arith.constant 0 : index
    %10 = vector.load %arg4[%c0_2, %c0_3] : memref<64x1xf32, #tpu.memory_space<vmem>>, vector<64x1xf32>
    %cst = arith.constant 0.000000e+00 : f32
    %11 = vector.shape_cast %10 : vector<64x1xf32> to vector<64x1xf32>
    %12 = vector.broadcast %11 : vector<64x1xf32> to vector<64x128xf32>
    %13 = vector.broadcast %cst : f32 to vector<64x128xf32>
    %14 = arith.select %9, %12, %13 : vector<64x128xi1>, vector<64x128xf32>
    %c0_4 = arith.constant 0 : index
    %c0_5 = arith.constant 0 : index
    %15 = vector.load %arg5[%c0_4, %c0_5] : memref<1x128xf32, #tpu.memory_space<vmem>>, vector<1x128xf32>
    %cst_6 = arith.constant dense<0.000000e+00> : vector<128xf32>
    %16 = vector.multi_reduction <add>, %14, %cst_6 [0] : vector<64x128xf32> to vector<128xf32>
    %17 = vector.shape_cast %16 : vector<128xf32> to vector<1x128xf32>
    %18 = arith.addf %15, %17 : vector<1x128xf32>
    %c0_7 = arith.constant 0 : index
    %c0_8 = arith.constant 0 : index
    %19 = vector.load %arg5[%c0_7, %c0_8] : memref<1x128xf32, #tpu.memory_space<vmem>>, vector<1x128xf32>
    tpu.vector_store %arg5[%c0_7, %c0_8], %18 {strides = array<i32>} : memref<1x128xf32, #tpu.memory_space<vmem>>, vector<1x128xf32>,
    return
  }
  func.func @transform_0(%arg0: i32, %arg1: i32, %arg2: memref<1xi32, #tpu.memory_space<smem>>) -> (i32, i32) {
    %0 = arith.index_cast %arg0 : i32 to index
    %1 = memref.load %arg2[%0] : memref<1xi32, #tpu.memory_space<smem>>
    %2 = arith.addi %1, %arg1 : i32
    %c0_i32 = arith.constant 0 : i32
    %c0_i32_0 = arith.constant 0 : i32
    return %2, %c0_i32 : i32, i32
  }
  func.func @transform_1(%arg0: i32, %arg1: i32, %arg2: memref<1xi32, #tpu.memory_space<smem>>) -> (i32, i32) {
    %0 = arith.index_cast %arg0 : i32 to index
    %1 = memref.load %arg2[%0] : memref<1xi32, #tpu.memory_space<smem>>
    %2 = arith.addi %1, %arg1 : i32
    %c0_i32 = arith.constant 0 : i32
    %c0_i32_0 = arith.constant 0 : i32
    return %2, %c0_i32 : i32, i32
  }
  func.func @transform_2(%arg0: i32, %arg1: i32, %arg2: memref<1xi32, #tpu.memory_space<smem>>) -> (i32, i32) {
    %c0_i32 = arith.constant 0 : i32
    %c0_i32_0 = arith.constant 0 : i32
    return %c0_i32, %arg0 : i32, i32
  }
}

</mosaic_0001>

<bundles_post_ra>
// kernel: tpu_custom_call.1
= control target key start
LH: loop header
LB: loop body
LE: loop exit
PB: predicated region body
PF: predicated region fallthrough
CT: control target
= control target key end

     0   :  { %s289_s0 = inlined_call_operand.<no memory space> [shape: s32[1], index: 0, kind: input, shape index: {}]   ;;  %s290_s1 = inlined_call_operand.vmem [shape: s32[64,1], index: 1, kind: input, shape index: {}]   ;;  %s291_s2 = inlined_call_operand.vmem [shape: f32[64,1], index: 2, kind: input, shape index: {}]   ;;  %s292_s3 = inlined_call_operand.hbm [shape: f32[1,128], index: 3, kind: output, shape index: {}]  }
   0x1   :  { %s218_s14 = sshll.u32 %s289_s0, 3 }
   0x2   :  { %9 = vsyncpa [#allocation5], 0  ;;  %v254_v0 = vmov 0   ;;  %p51_p0 = scmp.lt.s32.totalorder %s218_s14, 7  ;;  %v73_v23 = vlaneseq  ;;  %v255_v27 = vmov 0.0   ;;  %s197_s23 = sshll.u32 %s292_s3, 4  ;;  %s198_s23 = int_to_ptr.hbm [resolvable:$true] %s197_s23 }
   0x3   :  { %227 = vset.pattern.permute.xlu2 %v254_v0  ;;  %226 = vset.pattern.permute.xlu1 %v254_v0  ;;  %72 = vst [vmem:[#allocation4] sm:$0x1] %v255_v27 }
   0x4   :  { %225 = vset.pattern.permute.xlu0 %v254_v0  ;;  %s294_s14 = smov (!%p51_p0, %s218_s14), 7  ;;  %v74_v25 = vand.u32 127, %v73_v23 }
   0x5   :  { %s219_s15 = sshll.u32 %s294_s14, 3 }
   0x6   :  { %s54_s18 = scalar_lea.vmem %s290_s1, %s219_s15  ;;  %s64_s20 = scalar_lea.vmem %s291_s2, %s219_s15 }
   0x7   :  { %v82_v1 = vld [vmem:[%s54_s18 + $0x20] sm:$0xff]  ;;  %v80_v2 = vld [vmem:[%s54_s18 + $0x10] sm:$0xff]  ;;  %v81_v5 = vld [vmem:[%s54_s18 + $0x18] sm:$0xff]  ;;  %s256_s1 = smov [#allocation4]  }
   0x8   :  { %v78_v3 = vld [vmem:[%s54_s18] sm:$0xff]  ;;  %99 = vperm.xlu2 %227, %v82_v1   ;;  %93 = vperm.xlu1 %226, %v80_v2   ;;  %v79_v6 = vld [vmem:[%s54_s18 + $0x8] sm:$0xff]  ;;  %v121_v7 = vld [vmem:[%s64_s20 + $0x18] sm:$0xff]  ;;  %s195_s2 = sshll.u32 %s256_s1, 4  ;;  %s196_s2 = int_to_ptr.vmem [resolvable:$true] %s195_s2 }
   0x9   :  { %87 = vperm.xlu0 %225, %v78_v3   ;;  %v118_v4 = vld [vmem:[%s64_s20] sm:$0xff]  ;;  %v120_v8 = vld [vmem:[%s64_s20 + $0x10] sm:$0xff]  ;;  %v119_v9 = vld [vmem:[%s64_s20 + $0x8] sm:$0xff] }
   0xa   :  { %v123_v10 = vld [vmem:[%s64_s20 + $0x28] sm:$0xff]  ;;  %v122_v12 = vld [vmem:[%s64_s20 + $0x20] sm:$0xff]  ;;  %v85_v13 = vld [vmem:[%s54_s18 + $0x38] sm:$0xff] }
   0xb   :  { %v83_v11 = vld [vmem:[%s54_s18 + $0x28] sm:$0xff]  ;;  %v124_v14 = vld [vmem:[%s64_s20 + $0x30] sm:$0xff]  ;;  %v125_v16 = vld [vmem:[%s64_s20 + $0x38] sm:$0xff] }
   0xc   :  { %v84_v15 = vld [vmem:[%s54_s18 + $0x30] sm:$0xff]  ;;  %v174_v56 = vld [vmem:[#allocation4] sm:$0x1] }
  0x10   :  { %128 = vperm.xlu2 %227, %v118_v4   ;;  %96 = vperm.xlu1 %226, %v81_v5  }
  0x11   :  { %90 = vperm.xlu0 %225, %v79_v6  }
  0x18   :  { %143 = vperm.xlu2 %227, %v121_v7   ;;  %138 = vperm.xlu1 %226, %v120_v8  }
  0x19   :  { %133 = vperm.xlu0 %225, %v119_v9  }
  0x20   :  { %153 = vperm.xlu2 %227, %v123_v10   ;;  %102 = vperm.xlu1 %226, %v83_v11  }
  0x21   :  { %148 = vperm.xlu0 %225, %v122_v12  }
  0x28   :  { %108 = vperm.xlu2 %227, %v85_v13   ;;  %158 = vperm.xlu1 %226, %v124_v14  }
  0x29   :  { %105 = vperm.xlu0 %225, %v84_v15  }
  0x31   :  { %163 = vperm.xlu0 %225, %v125_v16  }
  0x62   :  { %v100_v17 = vpop.permute.xlu2 %99 }
  0x63   :  { %vm114_vm4 = vcmp.eq.s32.totalorder %v74_v25, %v100_v17 }
  0x6a   :  { %v129_v20 = vpop.permute.xlu2 %128 }
  0x72   :  { %v144_v28 = vpop.permute.xlu2 %143 }
  0x7a   :  { %v94_v18 = vpop.permute.xlu1 %93  ;;  %v154_v34 = vpop.permute.xlu2 %153 }
  0x7b   :  { %v88_v19 = vpop.permute.xlu0 %87  ;;  %vm112_vm2 = vcmp.eq.s32.totalorder %v74_v25, %v94_v18 }
  0x7c   :  { %vm110_vm0 = vcmp.eq.s32.totalorder %v74_v25, %v88_v19 }
  0x7d   :  { %v166_v30 = vsel %vm110_vm0, %v129_v20, 0.0 }
  0x82   :  { %v97_v21 = vpop.permute.xlu1 %96  ;;  %v109_v44 = vpop.permute.xlu2 %108 }
  0x83   :  { %v91_v22 = vpop.permute.xlu0 %90  ;;  %vm113_vm3 = vcmp.eq.s32.totalorder %v74_v25, %v97_v21  ;;  %vm117_vm7 = vcmp.eq.s32.totalorder %v74_v25, %v109_v44 }
  0x84   :  { %vm111_vm1 = vcmp.eq.s32.totalorder %v74_v25, %v91_v22  ;;  %v169_v37 = vsel %vm113_vm3, %v144_v28, 0.0 }
  0x8a   :  { %v139_v24 = vpop.permute.xlu1 %138 }
  0x8b   :  { %v134_v26 = vpop.permute.xlu0 %133  ;;  %v168_v35 = vsel %vm112_vm2, %v139_v24, 0.0 }
  0x8c   :  { %v167_v29 = vsel %vm111_vm1, %v134_v26, 0.0 }
  0x8d   :  { %v175_v31 = vadd.f32 %v167_v29, %v166_v30 }
  0x8f   :  { %v176_v36 = vadd.f32 %v175_v31, %v168_v35 }
  0x91   :  { %v177_v39 = vadd.f32 %v176_v36, %v169_v37 }
  0x92   :  { %v103_v32 = vpop.permute.xlu1 %102 }
  0x93   :  { %v149_v33 = vpop.permute.xlu0 %148  ;;  %vm115_vm5 = vcmp.eq.s32.totalorder %v74_v25, %v103_v32 }
  0x94   :  { %v170_v38 = vsel %vm114_vm4, %v149_v33, 0.0  ;;  %v171_v43 = vsel %vm115_vm5, %v154_v34, 0.0 }
  0x95   :  { %v178_v41 = vadd.f32 %v177_v39, %v170_v38 }
  0x97   :  { %v179_v46 = vadd.f32 %v178_v41, %v171_v43 }
  0x9a   :  { %v159_v42 = vpop.permute.xlu1 %158 }
  0x9b   :  { %v106_v40 = vpop.permute.xlu0 %105 }
  0x9c   :  { %vm116_vm6 = vcmp.eq.s32.totalorder %v74_v25, %v106_v40 }
  0x9d   :  { %v172_v45 = vsel %vm116_vm6, %v159_v42, 0.0 }
  0x9e   :  { %v180_v47 = vadd.f32 %v179_v46, %v172_v45 }
  0xa3   :  { %v164_v48 = vpop.permute.xlu0 %163 }
  0xa4   :  { %v173_v49 = vsel %vm117_vm7, %v164_v48, 0.0 }
  0xa5   :  { %v181_v50 = vadd.f32 %v180_v47, %v173_v49 }
  0xa7   :  { %v182_v51 = vrot.slane %v181_v50, 4 }
  0xa9   :  { %v183_v52 = vadd.f32 %v182_v51, %v181_v50 }
  0xab   :  { %v184_v53 = vrot.slane %v183_v52, 2 }
  0xad   :  { %v185_v54 = vadd.f32 %v184_v53, %v183_v52 }
  0xaf   :  { %v186_v55 = vrot.slane %v185_v54, 1 }
  0xb1   :  { %v187_v57 = vadd.f32 %v186_v55, %v185_v54 }
  0xb3   :  { %v188_v58 = vadd.f32 %v187_v57, %v174_v56 }
  0xb5   :  { %189 = vst [vmem:[#allocation4] sm:$0x1] %v188_v58 }
  0xb6   :  { %200 = dma.vmem_to_hbm [thread:$0]  %s196_s2, 16, %s198_s23, [#allocation5]  }
  0xb7   :  { %252 = dma.done.wait [#allocation5], 16  }
  0xb8   :  { %253 = vsyncadd [#allocation5], 4294967280 }
  0xb9   :  { %205 = vsyncpa [#allocation5], 1 }

</bundles_post_ra>
